<compile_context>
chip_gen: v5e
topology: v5e:2x2
jax: 0.10.0
libtpu: 0.0.40
codegen_flags: <defaults>
</compile_context>

<pallas_src>
import jax
import jax.numpy as jnp
from jax.experimental import pallas as pl
from jax.experimental.pallas import tpu as pltpu


def _round_up(x, m):
    return (x + m - 1) // m * m


def contrastive_head_kernel(h_ref, m_ref, w_ref, b_ref, o_ref,
                            pooled_ref, count_ref):
    si = pl.program_id(1)

    @pl.when(si == 0)
    def _init():
        pooled_ref[...] = jnp.zeros_like(pooled_ref)
        count_ref[...] = jnp.zeros_like(count_ref)

    h = h_ref[...]                                     # [tb, ts, D] (input dtype)
    m = m_ref[...]                                     # [tb, ts] f32

    # Mask-folded pooling: pooled[b, 0, :] += sum_s m[b, s] * h[b, s, :]
    # Batched (M=1) MXU matmul with f32 accumulation; h stays narrow.
    m_h = m.astype(h.dtype)[:, None, :]                # [tb, 1, ts] (0/1 exact)
    pooled_ref[...] += jnp.einsum(
        "bks,bsd->bkd", m_h, h,
        preferred_element_type=jnp.float32)            # [tb, 1, D]
    count_ref[...] += jnp.sum(m, axis=1, keepdims=True)

    @pl.when(si == pl.num_programs(1) - 1)
    def _finalize():
        w = w_ref[...].astype(jnp.float32)             # [1, D]
        # tiny projection, done once per batch tile (not per token / per step)
        proj = jnp.sum(pooled_ref[...] * w[None, :, :], axis=2)   # [tb, 1]
        # NOTE: fully-padded rows (count == 0) give NaN/Inf, matching PyTorch;
        # wrapper-padded batch rows are sliced off by the caller.
        avg = proj / count_ref[...] + b_ref[0, 0]
        o_ref[...] = jax.nn.sigmoid(avg).astype(o_ref.dtype)


def _vmem_capacity_bytes():
    try:
        info = pltpu.get_tpu_info()
        cap = int(getattr(info, "vmem_capacity_bytes", 0) or 0)
        if cap > 0:
            return cap
    except Exception:
        pass
    return 64 * 1024 * 1024     # conservative fallback (v7x per-TC VMEM)


def _pick_tiles(Bp, Sp, D, itemsize, per_buf_budget):
    """Choose (tb, ts) respecting (8,128) block rules and the VMEM budget."""
    def hbytes(tb, ts):
        return tb * ts * D * itemsize

    tb = 8 if Bp % 8 == 0 else Bp        # Bp % 8 != 0 only when Bp = B < 8
    ts = 128 if Sp % 128 == 0 else Sp    # Sp % 128 != 0 only when Sp = S < 128
    # Grow the seq tile (power-of-two multiples) while it divides Sp and fits.
    while Sp % (ts * 2) == 0 and hbytes(tb, ts * 2) <= per_buf_budget:
        ts *= 2
    # Then grow the batch tile (multiples of 8 dividing Bp) so short-sequence
    # inputs still get large per-step DMAs; keep >= 2 blocks on the batch axis
    # so the "parallel" dimension can shard across v7x's 2 TensorCores.
    while (Bp % (tb * 2) == 0 and Bp // (tb * 2) >= 2
           and hbytes(tb * 2, ts) <= per_buf_budget):
        tb *= 2
    return tb, ts


def contrastive_head(hidden_states, mask, weight, bias):
    """hidden_states: [B, S, D]; mask: [B, S] (1=keep, 0=pad, values in {0,1});
    weight: [1, D] or [D] (nn.Linear(D,1) layout); bias: scalar-like.
    Returns sigmoid(masked-avg-pool(out_proj(hidden))) as [B, 1] float32."""
    B, S, D = hidden_states.shape
    itemsize = hidden_states.dtype.itemsize

    # Mask as f32: avoids 1-byte sublane-packing hazards; bandwidth negligible.
    mask = jnp.asarray(mask).astype(jnp.float32)

    # Pad to legal tile multiples. Zero-padding is exact for the mask-folded
    # math; padded batch rows are sliced off before returning.
    Bp = B if B < 8 else _round_up(B, 8)
    Sp = S if S < 128 else _round_up(S, 128)
    if (Bp, Sp) != (B, S):
        hidden_states = jnp.pad(hidden_states,
                                ((0, Bp - B), (0, Sp - S), (0, 0)))
        mask = jnp.pad(mask, ((0, Bp - B), (0, Sp - S)))

    vmem_cap = _vmem_capacity_bytes()
    per_buf_budget = min(20 * 1024 * 1024, vmem_cap // 3)
    tb, ts = _pick_tiles(Bp, Sp, D, itemsize, per_buf_budget)
    grid = (Bp // tb, Sp // ts)

    # Estimate the real VMEM footprint (with sublane/lane layout padding) and
    # set an explicit vmem_limit_bytes; hard-fail if it cannot fit on-chip.
    D_pad = _round_up(D, 128)
    hidden_blk = tb * _round_up(ts, 8) * D_pad * itemsize
    mask_blk = _round_up(tb, 8) * _round_up(ts, 128) * 4
    need = (2 * hidden_blk                      # double-buffered hidden
            + 2 * mask_blk                      # double-buffered mask
            + 2 * 8 * D_pad * 4                 # weight (VMEM-resident)
            + tb * 8 * D_pad * 4                # pooled accumulator
            + 2 * _round_up(tb, 8) * 128 * 4    # count scratch + output
            + _round_up(tb, 8) * 128 * 4)
    hard_cap = int(vmem_cap * 0.92)
    if need > hard_cap:
        raise ValueError(
            f"ContrastiveHead tile ({tb},{ts},{D}) needs ~{need >> 20} MiB VMEM "
            f"but only ~{hard_cap >> 20} MiB is available; D blocking required.")
    vmem_limit = int(min(hard_cap, max(need + need // 4 + (2 << 20), 32 << 20)))

    weight = jnp.asarray(weight).reshape(1, D)
    bias = jnp.asarray(bias, dtype=jnp.float32).reshape(1, 1)

    cost = pl.CostEstimate(
        flops=2 * Bp * Sp * D + 2 * Bp * D,
        transcendentals=Bp,
        bytes_accessed=(Bp * Sp * D * itemsize
                        + Bp * Sp * 4
                        + D * weight.dtype.itemsize
                        + Bp * 4),
    )

    out = pl.pallas_call(
        contrastive_head_kernel,
        out_shape=jax.ShapeDtypeStruct((Bp, 1), jnp.float32),
        grid=grid,
        in_specs=[
            pl.BlockSpec((tb, ts, D), lambda bi, si: (bi, si, 0)),   # hidden
            pl.BlockSpec((tb, ts), lambda bi, si: (bi, si)),         # mask (f32)
            pl.BlockSpec((1, D), lambda bi, si: (0, 0)),             # weight, VMEM-resident
            pl.BlockSpec(memory_space=pltpu.MemorySpace.SMEM),       # bias scalar in SMEM
        ],
        out_specs=pl.BlockSpec((tb, 1), lambda bi, si: (bi, 0)),     # revisited over seq
        scratch_shapes=[
            pltpu.VMEM((tb, 1, D), jnp.float32),   # pooled accumulator
            pltpu.VMEM((tb, 1), jnp.float32),      # mask-count accumulator
        ],
        compiler_params=pltpu.CompilerParams(
            dimension_semantics=("parallel", "arbitrary"),
            vmem_limit_bytes=vmem_limit,
        ),
        cost_estimate=cost,
    )(hidden_states, mask, weight, bias)

    return out if Bp == B else out[:B]


def _reference(hidden, mask, weight, bias):
    """Pure-JAX mirror of the PyTorch forward."""
    w = jnp.asarray(weight).reshape(-1).astype(jnp.float32)
    b = jnp.asarray(bias, dtype=jnp.float32).reshape(())
    logits = jnp.einsum("bsd,d->bs", hidden.astype(jnp.float32), w) + b
    mask_f = jnp.asarray(mask).astype(jnp.float32)
    masked = jnp.where(mask_f == 0, 0.0, logits)
    length = jnp.sum(mask_f, axis=1, keepdims=True)
    avg = jnp.sum(masked, axis=1, keepdims=True) / length
    return jax.nn.sigmoid(avg)


if __name__ == "__main__":
    key = jax.random.PRNGKey(0)

    # Case 1: tiny, unaligned shapes (B<8, S<128) -> full-extent blocks.
    B, S, D = 2, 8, 32
    k1, k2, k3 = jax.random.split(key, 3)
    hidden = jax.random.normal(k1, (B, S, D), dtype=jnp.float32)
    mask = jnp.array([[1, 1, 1, 1, 1, 0, 0, 0],
                      [1, 1, 1, 1, 1, 1, 1, 0]], dtype=jnp.float32)
    weight = jax.random.normal(k2, (1, D), dtype=jnp.float32) * 0.1
    bias = jax.random.normal(k3, (1, 1), dtype=jnp.float32) * 0.1

    out = jax.block_until_ready(contrastive_head(hidden, mask, weight, bias))
    ref = _reference(hidden, mask, weight, bias)
    assert out.shape == (B, 1)
    assert jnp.allclose(out, ref, atol=1e-5, rtol=1e-5), (out, ref)

    # Case 2: exercises batch/seq padding (12->16, 300->384), a multi-step seq
    # reduction (grid[1] == 3), >=2 batch blocks, and an integer mask input.
    B2, S2, D2 = 12, 300, 64
    k4, k5, k6, k7 = jax.random.split(jax.random.PRNGKey(0), 4)
    hidden2 = jax.random.normal(k4, (B2, S2, D2), dtype=jnp.float32)
    lengths = jax.random.randint(k5, (B2, 1), 1, S2 + 1)
    mask2 = (jnp.arange(S2)[None, :] < lengths).astype(jnp.int32)
    weight2 = jax.random.normal(k6, (1, D2), dtype=jnp.float32) * 0.1
    bias2 = jax.random.normal(k7, (1, 1), dtype=jnp.float32) * 0.1

    out2 = jax.block_until_ready(contrastive_head(hidden2, mask2, weight2, bias2))
    ref2 = _reference(hidden2, mask2, weight2, bias2)
    assert out2.shape == (B2, 1)
    assert jnp.allclose(out2, ref2, atol=1e-5, rtol=1e-5), (out2, ref2)

    print("KERNEL_OK")
</pallas_src>

<mosaic_0001>
module attributes {stable_mosaic.version = 11 : i64} {
  func.func @contrastive_head_kernel(%arg0: i32, %arg1: i32, %arg2: memref<2x8x32xf32, #tpu.memory_space<vmem>>, %arg3: memref<2x8xf32, #tpu.memory_space<vmem>>, %arg4: memref<1x32xf32, #tpu.memory_space<vmem>>, %arg5: memref<1x1xf32, #tpu.memory_space<smem>>, %arg6: memref<2x1xf32, #tpu.memory_space<vmem>>, %arg7: memref<2x1x32xf32, #tpu.memory_space<vmem>>, %arg8: memref<2x1xf32, #tpu.memory_space<vmem>>) attributes {dimension_semantics = [#tpu.dimension_semantics<parallel>, #tpu.dimension_semantics<arbitrary>], iteration_bounds = array<i64: 1, 1>, scalar_prefetch = 0 : i64, scratch_operands = 2 : i64, tpu.core_type = #tpu.core_type<tc>, window_params = [{transform_indices = @transform_0, window_bounds = array<i64: 2, 8, 32>}, {transform_indices = @transform_1, window_bounds = array<i64: 2, 8>}, {pipeline_mode = #tpu.pipeline_mode<synchronous>, transform_indices = @transform_2, window_bounds = array<i64: 1, 32>}, {transform_indices = @transform_3, window_bounds = array<i64: 1, 1>}, {transform_indices = @transform_4, window_bounds = array<i64: 2, 1>}]} {
    %c0_i32 = arith.constant 0 : i32
    %0 = arith.cmpi eq, %arg1, %c0_i32 : i32
    %1 = arith.extui %0 : i1 to i32
    %c0_i32_0 = arith.constant 0 : i32
    %2 = arith.cmpi ne, %1, %c0_i32_0 : i32
    scf.if %2 {
      %cst_18 = arith.constant 0.000000e+00 : f32
      %18 = vector.broadcast %cst_18 : f32 to vector<2x1x32xf32>
      %c0_19 = arith.constant 0 : index
      %c0_20 = arith.constant 0 : index
      %c0_21 = arith.constant 0 : index
      %19 = vector.load %arg7[%c0_19, %c0_20, %c0_21] : memref<2x1x32xf32, #tpu.memory_space<vmem>>, vector<2x1x32xf32>
      tpu.vector_store %arg7[%c0_19, %c0_20, %c0_21], %18 {strides = array<i32>} : memref<2x1x32xf32, #tpu.memory_space<vmem>>, vector<2x1x32xf32>,
      %cst_22 = arith.constant 0.000000e+00 : f32
      %20 = vector.broadcast %cst_22 : f32 to vector<2x1xf32>
      %c0_23 = arith.constant 0 : index
      %c0_24 = arith.constant 0 : index
      %21 = vector.load %arg8[%c0_23, %c0_24] : memref<2x1xf32, #tpu.memory_space<vmem>>, vector<2x1xf32>
      tpu.vector_store %arg8[%c0_23, %c0_24], %20 {strides = array<i32>} : memref<2x1xf32, #tpu.memory_space<vmem>>, vector<2x1xf32>,
    } else {
    }
    %c0 = arith.constant 0 : index
    %c0_1 = arith.constant 0 : index
    %c0_2 = arith.constant 0 : index
    %3 = vector.load %arg2[%c0, %c0_1, %c0_2] : memref<2x8x32xf32, #tpu.memory_space<vmem>>, vector<2x8x32xf32>
    %c0_3 = arith.constant 0 : index
    %c0_4 = arith.constant 0 : index
    %4 = vector.load %arg3[%c0_3, %c0_4] : memref<2x8xf32, #tpu.memory_space<vmem>>, vector<2x8xf32>
    %5 = vector.shape_cast %4 : vector<2x8xf32> to vector<2x1x8xf32>
    %c0_5 = arith.constant 0 : index
    %c0_6 = arith.constant 0 : index
    %c0_7 = arith.constant 0 : index
    %6 = vector.load %arg7[%c0_5, %c0_6, %c0_7] : memref<2x1x32xf32, #tpu.memory_space<vmem>>, vector<2x1x32xf32>
    "tpu.trace_start"() <{level = 10 : i32, message = "bks,bsd->bkd"}> : () -> ()
    %cst = arith.constant dense<0.000000e+00> : vector<2x1x32xf32>
    %7 = tpu.matmul %5, %3, %cst {dimension_numbers = #tpu.dot_dimension_numbers<[2], [1], [1], [2], [0, 0, 0, 1, 1, 2], [0], [0]>} : vector<2x1x8xf32>, vector<2x8x32xf32>, vector<2x1x32xf32> -> vector<2x1x32xf32>
    "tpu.trace_stop"() : () -> ()
    %8 = arith.addf %6, %7 : vector<2x1x32xf32>
    %c0_8 = arith.constant 0 : index
    %c0_9 = arith.constant 0 : index
    %c0_10 = arith.constant 0 : index
    %9 = vector.load %arg7[%c0_8, %c0_9, %c0_10] : memref<2x1x32xf32, #tpu.memory_space<vmem>>, vector<2x1x32xf32>
    tpu.vector_store %arg7[%c0_8, %c0_9, %c0_10], %8 {strides = array<i32>} : memref<2x1x32xf32, #tpu.memory_space<vmem>>, vector<2x1x32xf32>,
    %c0_11 = arith.constant 0 : index
    %c0_12 = arith.constant 0 : index
    %10 = vector.load %arg8[%c0_11, %c0_12] : memref<2x1xf32, #tpu.memory_space<vmem>>, vector<2x1xf32>
    %cst_13 = arith.constant dense<0.000000e+00> : vector<2xf32>
    %11 = vector.multi_reduction <add>, %4, %cst_13 [1] : vector<2x8xf32> to vector<2xf32>
    %12 = vector.shape_cast %11 : vector<2xf32> to vector<2x1xf32>
    %13 = arith.addf %10, %12 : vector<2x1xf32>
    %c0_14 = arith.constant 0 : index
    %c0_15 = arith.constant 0 : index
    %14 = vector.load %arg8[%c0_14, %c0_15] : memref<2x1xf32, #tpu.memory_space<vmem>>, vector<2x1xf32>
    tpu.vector_store %arg8[%c0_14, %c0_15], %13 {strides = array<i32>} : memref<2x1xf32, #tpu.memory_space<vmem>>, vector<2x1xf32>,
    %c0_i32_16 = arith.constant 0 : i32
    %15 = arith.cmpi eq, %arg1, %c0_i32_16 : i32
    %16 = arith.extui %15 : i1 to i32
    %c0_i32_17 = arith.constant 0 : i32
    %17 = arith.cmpi ne, %16, %c0_i32_17 : i32
    scf.if %17 {
      %c0_18 = arith.constant 0 : index
      %c0_19 = arith.constant 0 : index
      %18 = vector.load %arg4[%c0_18, %c0_19] : memref<1x32xf32, #tpu.memory_space<vmem>>, vector<1x32xf32>
      %c0_20 = arith.constant 0 : index
      %c0_21 = arith.constant 0 : index
      %c0_22 = arith.constant 0 : index
      %19 = vector.load %arg7[%c0_20, %c0_21, %c0_22] : memref<2x1x32xf32, #tpu.memory_space<vmem>>, vector<2x1x32xf32>
      %20 = vector.shape_cast %18 : vector<1x32xf32> to vector<1x1x32xf32>
      %21 = vector.broadcast %20 : vector<1x1x32xf32> to vector<2x1x32xf32>
      %22 = arith.mulf %19, %21 : vector<2x1x32xf32>
      %cst_23 = arith.constant dense<0.000000e+00> : vector<2x1xf32>
      %23 = vector.multi_reduction <add>, %22, %cst_23 [2] : vector<2x1x32xf32> to vector<2x1xf32>
      %c0_24 = arith.constant 0 : index
      %c0_25 = arith.constant 0 : index
      %24 = vector.load %arg8[%c0_24, %c0_25] : memref<2x1xf32, #tpu.memory_space<vmem>>, vector<2x1xf32>
      %25 = arith.divf %23, %24 : vector<2x1xf32>
      %c0_26 = arith.constant 0 : index
      %c0_27 = arith.constant 0 : index
      %26 = memref.load %arg5[%c0_26, %c0_27] : memref<1x1xf32, #tpu.memory_space<smem>>
      %27 = vector.broadcast %26 : f32 to vector<2x1xf32>
      %28 = arith.addf %25, %27 : vector<2x1xf32>
      %29 = arith.negf %28 : vector<2x1xf32>
      %30 = math.exp %29 : vector<2x1xf32>
      %cst_28 = arith.constant 1.000000e+00 : f32
      %31 = vector.broadcast %cst_28 : f32 to vector<2x1xf32>
      %32 = arith.addf %31, %30 : vector<2x1xf32>
      %33 = arith.divf %31, %32 : vector<2x1xf32>
      %c0_29 = arith.constant 0 : index
      %c0_30 = arith.constant 0 : index
      %34 = vector.load %arg6[%c0_29, %c0_30] : memref<2x1xf32, #tpu.memory_space<vmem>>, vector<2x1xf32>
      tpu.vector_store %arg6[%c0_29, %c0_30], %33 {strides = array<i32>} : memref<2x1xf32, #tpu.memory_space<vmem>>, vector<2x1xf32>,
    } else {
    }
    return
  }
  func.func @transform_0(%arg0: i32, %arg1: i32) -> (i32, i32, i32) {
    %c0_i32 = arith.constant 0 : i32
    %c0_i32_0 = arith.constant 0 : i32
    return %arg0, %arg1, %c0_i32 : i32, i32, i32
  }
  func.func @transform_1(%arg0: i32, %arg1: i32) -> (i32, i32) {
    %c0_i32 = arith.constant 0 : i32
    return %arg0, %arg1 : i32, i32
  }
  func.func @transform_2(%arg0: i32, %arg1: i32) -> (i32, i32) {
    %c0_i32 = arith.constant 0 : i32
    %c0_i32_0 = arith.constant 0 : i32
    %c0_i32_1 = arith.constant 0 : i32
    return %c0_i32, %c0_i32_0 : i32, i32
  }
  func.func @transform_3(%arg0: i32, %arg1: i32) -> (i32, i32) {
    %c0_i32 = arith.constant 0 : i32
    %c0_i32_0 = arith.constant 0 : i32
    %c0_i32_1 = arith.constant 0 : i32
    return %c0_i32, %c0_i32_0 : i32, i32
  }
  func.func @transform_4(%arg0: i32, %arg1: i32) -> (i32, i32) {
    %c0_i32 = arith.constant 0 : i32
    %c0_i32_0 = arith.constant 0 : i32
    return %arg0, %c0_i32 : i32, i32
  }
}

</mosaic_0001>

<bundles_post_ra>
// kernel: tpu_custom_call.1
= control target key start
LH: loop header
LB: loop body
LE: loop exit
PB: predicated region body
PF: predicated region fallthrough
CT: control target
= control target key end

     0   :  { %10 = vsyncpa [#allocation6], 0  ;;  %s272_s18 = smov [#allocation5]   ;;  %s273_s20 = smov 128   ;;  %s325_s0 = inlined_call_operand.hbm [shape: f32[2,8,32], index: 0, kind: input, shape index: {}]   ;;  %s326_s1 = inlined_call_operand.vmem [shape: f32[2,8], index: 1, kind: input, shape index: {}]   ;;  %s327_s2 = inlined_call_operand.vmem [shape: f32[1,32], index: 2, kind: input, shape index: {}]   ;;  %s328_s3 = inlined_call_operand.<no memory space> [shape: f32[1,1], index: 3, kind: input, shape index: {}]   ;;  %s329_s4 = inlined_call_operand.vmem [shape: f32[2,1], index: 4, kind: output, shape index: {}]  }
   0x1   :  { %s15_s17 = sshll.u32 %s325_s0, 4  ;;  %s17_s19 = sshll.u32 %s272_s18, 4  ;;  %s16_s17 = int_to_ptr.hbm [resolvable:$true] %s15_s17  ;;  %s18_s19 = int_to_ptr.vmem [resolvable:$true] %s17_s19 }
   0x2   :  { %s274_s21 = smov 8  }
   0x3   :  { %23 = dma.hbm_to_vmem [thread:$0]  %s16_s17, 256, %s18_s19, [#allocation6], %s273_s20, %s273_s20, %s274_s21  }
   0x4   :  { %270 = dma.done.wait [#allocation6], 256  }
   0x5   :  { %271 = vsyncadd [#allocation6], 4294967040  ;;  %vm41_vm0 = vcmask 1024   ;;  %v275_v0 = vmov 0.0   ;;  %vm101_vm1 = vcmask 58368   ;;  %vm50_vm2 = vcmask 64512  }
   0x6   :  { %42 = vst.msk [vmem:[#allocation3] sm:$0x3] %vm41_vm0, %v275_v0  ;;  %v45_v1 = vld [vmem:[%s326_s1] sm:$0x3]  ;;  %v43_v2 = vld [vmem:[#allocation5] sm:$0xff]  ;;  %v44_v3 = vld [vmem:[#allocation5 + $0x8] sm:$0xff]  ;;  %v125_v6 = vlaneseq  ;;  %v171_v43 = vstv %s328_s3 }
   0x7   :  { %v102_v4 = vsel %vm101_vm1, %v45_v1, 0.0  ;;  %68 = vmatpush.msra.mxu0 %v43_v2  ;;  %90 = vmatpush.msra.mxu1 %v44_v3  ;;  %v47_v5 = vrot.slane %v45_v1, 1  ;;  %vm38_vm3 = vcmask 253952   ;;  %v111_v20 = vld [vmem:[%s327_s2] sm:$0x1] }
   0x8   :  { %103 = vadd.xlane.f32.xlu0 %v102_v4  ;;  %224 = vmatmul.msk.f32.vlgmr.msra.gmra.mxu0 %vm50_vm2, %v45_v1  ;;  %v126_v7 = vshrl.u32 %v125_v6, 7  ;;  %39 = vst.msk [vmem:[#allocation2] sm:$0x1] %vm38_vm3, %v275_v0 }
   0x9   :  { %225 = vmatmul.msk.f32.vlgmr.msra.gmra.mxu1 %vm50_vm2, %v47_v5  ;;  %40 = vst.msk [vmem:[#allocation2 + $0x1] sm:$0x1] %vm38_vm3, %v275_v0 }
   0xa   :  { %233 = vset.pattern.permute.xlu1 %v126_v7  ;;  %232 = vset.pattern.permute.xlu0 %v126_v7 }
   0xd   :  { %v100_v8 = vld [vmem:[#allocation3] sm:$0x3] }
   0xf   :  { %v48_v11 = vld [vmem:[#allocation2] sm:$0x1] }
  0x10   :  { %v49_v12 = vld [vmem:[#allocation2 + $0x1] sm:$0x1] }
  0x7b   :  { %v104_v9 = vpop.xlane.xlu0 %103 }
  0x7c   :  { %v105_v10 = vadd.f32 %v104_v9, %v100_v8 }
  0x7e   :  { %107 = vst.msk [vmem:[#allocation3] sm:$0x3] %vm41_vm0, %v105_v10 }
  0x85   :  { %v122_v13 = vld [vmem:[#allocation3] sm:$0x3]  ;;  %v70_v14 = vpop.f32.mrf.mxu0 }
  0x86   :  { %v131_v15 = vperm.slane %v122_v13, 1  ;;  %v124_v16 = vperm.slane %v122_v13, 0  ;;  %v95_v17 = vadd.f32 %v70_v14, %v48_v11  ;;  %v92_v18 = vpop.f32.mrf.mxu1 }
  0x87   :  { %v96_v19 = vadd.f32 %v92_v18, %v49_v12 }
  0x88   :  { %136 = vperm.xlu0 %232, %v131_v15   ;;  %129 = vperm.xlu1 %233, %v124_v16   ;;  %98 = vst.msk [vmem:[#allocation2] sm:$0x1] %vm38_vm3, %v95_v17 }
  0x89   :  { %99 = vst.msk [vmem:[#allocation2 + $0x1] sm:$0x1] %vm38_vm3, %v96_v19 }
  0x8f   :  { %v112_v21 = vld [vmem:[#allocation2] sm:$0x1] }
  0x90   :  { %v114_v22 = vmul.f32 %v112_v21, %v111_v20  ;;  %v113_v24 = vld [vmem:[#allocation2 + $0x1] sm:$0x1] }
  0x91   :  { %v115_v25 = vmul.f32 %v113_v24, %v111_v20 }
  0x92   :  { %v116_v23 = vsel %vm38_vm3, %v114_v22, 0.0 }
  0x93   :  { %117 = vadd.xlane.f32.xlu2 %v116_v23  ;;  %v119_v26 = vsel %vm38_vm3, %v115_v25, 0.0 }
  0xb2   :  { %120 = vadd.xlane.f32.xlu1 %v119_v26 }
  0xfa   :  { %v130_v27 = vpop.permute.xlu1 %129  ;;  %v137_v31 = vpop.permute.xlu0 %136 }
  0xfb   :  { %234 = vrcp.f32 %v130_v27  ;;  %v151_v34 = vand.u32 2147483648, %v130_v27  ;;  %vm145_vm5 = vweird.f32 %v130_v27  ;;  %v149_v35 = vand.u32 2147483647, %v130_v27 }
  0xfc   :  { %236 = vrcp.f32 %v137_v31  ;;  %v166_v49 = vand.u32 2147483648, %v137_v31  ;;  %vm160_vm9 = vweird.f32 %v137_v31  ;;  %v164_v50 = vand.u32 2147483647, %v137_v31 }
  0xfd   :  { %v152_v37 = vor.u32 1.1754944e-38, %v151_v34  ;;  %vm150_vm7 = vcmp.eq.f32.partialorder %v149_v35, 8.507059e+37 }
  0xfe   :  { %v167_v52 = vor.u32 1.1754944e-38, %v166_v49  ;;  %vm165_vm11 = vcmp.eq.f32.partialorder %v164_v50, 8.507059e+37 }
 0x101   :  { %v235_v28 = vpop.eup %234 }
 0x102   :  { %v141_v29 = vmul.f32 %v235_v28, %v130_v27  ;;  %vm146_vm4 = vweird.f32 %v235_v28  ;;  %v237_v38 = vpop.eup %236 }
 0x103   :  { %vm147_vm6 = vmor %vm145_vm5, %vm146_vm4  ;;  %v156_v41 = vmul.f32 %v237_v38, %v137_v31  ;;  %vm161_vm8 = vweird.f32 %v237_v38  ;;  %vm215_vm4 = vcmask 1041409  }
 0x104   :  { %v142_v30 = vsub.f32 1.0, %v141_v29  ;;  %vm162_vm10 = vmor %vm160_vm9, %vm161_vm8 }
 0x105   :  { %v157_v44 = vsub.f32 1.0, %v156_v41 }
 0x106   :  { %v143_v32 = vmul.f32 %v235_v28, %v142_v30  ;;  %v118_v40 = vpop.xlane.xlu2 %117 }
 0x107   :  { %v158_v46 = vmul.f32 %v237_v38, %v157_v44 }
 0x108   :  { %v144_v33 = vadd.f32 %v235_v28, %v143_v32 }
 0x109   :  { %v159_v48 = vadd.f32 %v237_v38, %v158_v46 }
 0x10a   :  { %v148_v36 = vsel %vm147_vm6, %v235_v28, %v144_v33 }
 0x10b   :  { %v153_v39 = vsel %vm150_vm7, %v152_v37, %v148_v36  ;;  %v163_v51 = vsel %vm162_vm10, %v237_v38, %v159_v48 }
 0x10c   :  { %v154_v42 = vmul.f32 %v153_v39, %v118_v40  ;;  %v168_v54 = vsel %vm165_vm11, %v167_v52, %v163_v51 }
 0x10e   :  { %v172_v45 = vadd.f32 %v171_v43, %v154_v42 }
 0x110   :  { %v226_v47 = vmul.f32 -1.442695, %v172_v45 }
 0x112   :  { %238 = vpow2.f32 %v226_v47 }
 0x118   :  { %v239_v53 = vpop.eup %238 }
 0x119   :  { %v180_v57 = vadd.f32 1.0, %v239_v53 }
 0x11b   :  { %240 = vrcp.f32 %v180_v57  ;;  %vm187_vm14 = vweird.f32 %v180_v57  ;;  %v193_v9 = vand.u32 2147483648, %v180_v57  ;;  %v191_v10 = vand.u32 2147483647, %v180_v57 }
 0x11d   :  { %v194_v15 = vor.u32 1.1754944e-38, %v193_v9  ;;  %vm192_vm5 = vcmp.eq.f32.partialorder %v191_v10, 8.507059e+37 }
 0x121   :  { %v241_v60 = vpop.eup %240 }
 0x122   :  { %v183_v63 = vmul.f32 %v241_v60, %v180_v57  ;;  %vm188_vm12 = vweird.f32 %v241_v60 }
 0x123   :  { %vm189_vm15 = vmor %vm187_vm14, %vm188_vm12 }
 0x124   :  { %v184_v0 = vsub.f32 1.0, %v183_v63 }
 0x125   :  { %v121_v55 = vpop.xlane.xlu1 %120 }
 0x126   :  { %v169_v56 = vmul.f32 %v168_v54, %v121_v55  ;;  %v185_v2 = vmul.f32 %v241_v60, %v184_v0 }
 0x128   :  { %v173_v58 = vadd.f32 %v171_v43, %v169_v56  ;;  %v186_v6 = vadd.f32 %v241_v60, %v185_v2 }
 0x12a   :  { %v227_v59 = vmul.f32 -1.442695, %v173_v58  ;;  %v190_v13 = vsel %vm189_vm15, %v241_v60, %v186_v6 }
 0x12b   :  { %v195_v18 = vsel %vm192_vm5, %v194_v15, %v190_v13 }
 0x12c   :  { %242 = vpow2.f32 %v227_v59 }
 0x132   :  { %v243_v61 = vpop.eup %242 }
 0x133   :  { %v181_v62 = vadd.f32 1.0, %v243_v61 }
 0x135   :  { %244 = vrcp.f32 %v181_v62  ;;  %v208_v5 = vand.u32 2147483648, %v181_v62  ;;  %v206_v8 = vand.u32 2147483647, %v181_v62  ;;  %vm202_vm1 = vweird.f32 %v181_v62 }
 0x137   :  { %v209_v12 = vor.u32 1.1754944e-38, %v208_v5  ;;  %vm207_vm3 = vcmp.eq.f32.partialorder %v206_v8, 8.507059e+37 }
 0x13b   :  { %v245_v1 = vpop.eup %244 }
 0x13c   :  { %v198_v3 = vmul.f32 %v245_v1, %v181_v62  ;;  %vm203_vm13 = vweird.f32 %v245_v1 }
 0x13d   :  { %vm204_vm2 = vmor %vm202_vm1, %vm203_vm13 }
 0x13e   :  { %v199_v4 = vsub.f32 1.0, %v198_v3 }
 0x140   :  { %v200_v7 = vmul.f32 %v245_v1, %v199_v4 }
 0x142   :  { %v201_v11 = vadd.f32 %v245_v1, %v200_v7 }
 0x144   :  { %v205_v14 = vsel %vm204_vm2, %v245_v1, %v201_v11 }
 0x145   :  { %v210_v16 = vsel %vm207_vm3, %v209_v12, %v205_v14 }
 0x146   :  { %v214_v17 = vrot.slane %v210_v16, 7 }
 0x148   :  { %v216_v19 = vsel %vm215_vm4, %v214_v17, %v195_v18 }
 0x149   :  { %218 = vst.msk [vmem:[%s329_s4] sm:$0x3] %vm41_vm0, %v216_v19 }
 0x14a   :  { %223 = vsyncpa [#allocation6], 1 }

</bundles_post_ra>
